<compile_context>
chip_gen: v5e
topology: v5e:2x2
jax: 0.10.0
libtpu: 0.0.40
codegen_flags: <defaults>
</compile_context>

<pallas_src>
import functools

import jax
import jax.numpy as jnp
from jax.experimental import pallas as pl
from jax.experimental.pallas import tpu as pltpu


HIDDEN = 128          # hidden_size implied by Linear(256, 256) following Linear(h, 2h)
H1 = 2 * HIDDEN       # 256
H = 256


def _round_up(x, m):
    return ((x + m - 1) // m) * m


def dense3_kernel(xf_ref, xs_ref,
                  w1f_ref, w1s_ref, b1_ref,
                  w2_ref, b2_ref,
                  w3_ref, b3_ref,
                  w4_ref, b4_ref,
                  o_ref):
    # Layer 1: fused concat — cat([f, s]) @ W1 == f @ W1[:f_dim] + s @ W1[f_dim:]
    h = (jnp.dot(xf_ref[...], w1f_ref[...], preferred_element_type=jnp.float32)
         + jnp.dot(xs_ref[...], w1s_ref[...], preferred_element_type=jnp.float32)
         + b1_ref[...])
    h = jnp.maximum(h, 0.0)                                   # f32 epilogue

    # Layer 2: [tb, 256] @ [256, 256] + b -> ReLU
    h = jnp.dot(h.astype(w2_ref.dtype), w2_ref[...],
                preferred_element_type=jnp.float32) + b2_ref[...]
    h = jnp.maximum(h, 0.0)

    # Layer 3
    h = jnp.dot(h.astype(w3_ref.dtype), w3_ref[...],
                preferred_element_type=jnp.float32) + b3_ref[...]
    h = jnp.maximum(h, 0.0)

    # Layer 4 (no activation)
    h = jnp.dot(h.astype(w4_ref.dtype), w4_ref[...],
                preferred_element_type=jnp.float32) + b4_ref[...]

    o_ref[...] = h.astype(o_ref.dtype)


def prepare_params(params, feature_dim, matmul_dtype=jnp.bfloat16):
    """One-time weight prep (hoisted out of the per-call path; cache the result).

    Splits W1 so the concat is fused into the kernel (two partial matmuls summed),
    casts matmul operands to `matmul_dtype`, and reshapes biases to f32 [1, 256] rows.
    """
    w1, b1, w2, b2, w3, b3, w4, b4 = params
    w1f = jnp.asarray(w1[:feature_dim], matmul_dtype)
    w1s = jnp.asarray(w1[feature_dim:], matmul_dtype)
    w2c, w3c, w4c = (jnp.asarray(w, matmul_dtype) for w in (w2, w3, w4))
    b1r, b2r, b3r, b4r = (jnp.asarray(b, jnp.float32).reshape(1, -1)
                          for b in (b1, b2, b3, b4))
    return (w1f, w1s, b1r, w2c, b2r, w3c, b3r, w4c, b4r)


@functools.partial(jax.jit, static_argnames=("tb", "out_dtype"))
def dense3_forward(features, state, prepped, *, tb=1024, out_dtype=jnp.float32):
    """features: [B, f], state: [B, s] with f + s == HIDDEN (=128). Returns [B, 256]."""
    B, f = features.shape
    _, s = state.shape
    assert f + s == HIDDEN, f"feature_dim + state_dim must be {HIDDEN}, got {f + s}"

    (w1f, w1s, b1r, w2c, b2r, w3c, b3r, w4c, b4r) = prepped
    mm_dtype = w1f.dtype
    xf = features.astype(mm_dtype)
    xs = state.astype(mm_dtype)

    # Batch tile: multiple of 16 rows (native bf16 (16,128) tile), capped by `tb`.
    tb_eff = min(_round_up(tb, 16), _round_up(B, 16))
    # v7x megacore: for large batches make sure there are >= 2 grid steps (256-row
    # granularity keeps each step MXU-filling) so both TensorCores get work.
    if B >= 512:
        tb_eff = min(tb_eff, _round_up(pl.cdiv(B, 2), 256))
    if tb_eff >= B:
        tb_eff = B          # single full-extent block — always a legal block shape
    grid = pl.cdiv(B, tb_eff)
    # No explicit padding: Pallas masks the partial last block. Safe because every
    # output row depends only on its own input row (no cross-row reduction).

    full = lambda r, c: pl.BlockSpec((r, c), lambda i: (0, 0))  # whole-array block

    w_bytes = jnp.dtype(mm_dtype).itemsize
    flops = 2 * B * (HIDDEN * H1 + 3 * H * H)
    bytes_accessed = (
        B * HIDDEN * w_bytes                                  # activations in
        + (HIDDEN * H1 + 3 * H * H) * w_bytes                 # weights (resident)
        + 4 * H * 4                                           # biases (f32)
        + B * H * jnp.dtype(out_dtype).itemsize)              # output

    out = pl.pallas_call(
        dense3_kernel,
        out_shape=jax.ShapeDtypeStruct((B, H), out_dtype),
        grid_spec=pltpu.PrefetchScalarGridSpec(
            num_scalar_prefetch=0,
            grid=(grid,),
            in_specs=[
                pl.BlockSpec((tb_eff, f), lambda i: (i, 0)),    # features tile
                pl.BlockSpec((tb_eff, s), lambda i: (i, 0)),    # state tile
                full(f, H1), full(s, H1), full(1, H1),          # w1f, w1s, b1
                full(H, H), full(1, H),                         # w2, b2
                full(H, H), full(1, H),                         # w3, b3
                full(H, H), full(1, H),                         # w4, b4
            ],
            out_specs=pl.BlockSpec((tb_eff, H), lambda i: (i, 0)),
        ),
        compiler_params=pltpu.CompilerParams(
            dimension_semantics=("parallel",)),
        cost_estimate=pl.CostEstimate(
            flops=flops, transcendentals=0, bytes_accessed=bytes_accessed),
    )(xf, xs, w1f, w1s, b1r, w2c, b2r, w3c, b3r, w4c, b4r)

    return out


def init_params(key):
    """Deterministic init mimicking PyTorch Linear default (U(-1/sqrt(in), 1/sqrt(in))).
    Weights stored as [in_features, out_features] so y = x @ W + b == PyTorch x @ W_pt.T + b."""
    shapes = [(HIDDEN, H1), (H1,), (H, H), (H,), (H, H), (H,), (H, H), (H,)]
    params = []
    for i, shp in enumerate(shapes):
        k = jax.random.fold_in(key, i)
        fan_in = shp[0] if len(shp) == 2 else shapes[i - 1][0]
        bound = 1.0 / jnp.sqrt(jnp.float32(fan_in))
        params.append(jax.random.uniform(k, shp, jnp.float32, -bound, bound))
    return tuple(params)


def dense3_reference(features, state, params):
    w1, b1, w2, b2, w3, b3, w4, b4 = params
    h = jnp.concatenate([features, state], axis=1)
    h = jnp.maximum(h @ w1 + b1, 0.0)
    h = jnp.maximum(h @ w2 + b2, 0.0)
    h = jnp.maximum(h @ w3 + b3, 0.0)
    return h @ w4 + b4


if __name__ == "__main__":
    key = jax.random.PRNGKey(0)
    k_feat, k_state, k_param = jax.random.split(key, 3)
    params = init_params(k_param)
    prepped = prepare_params(params, feature_dim=64)   # cached bf16/split weights

    # Test 1: small batch, single full-extent block.
    B = 8
    feat_dim, state_dim = 64, 64          # 64 + 64 == hidden_size == 128
    features = jax.random.normal(k_feat, (B, feat_dim), jnp.float32)
    state = jax.random.normal(k_state, (B, state_dim), jnp.float32)

    out = jax.block_until_ready(dense3_forward(features, state, prepped))
    ref = dense3_reference(features, state, params)
    assert out.shape == (B, 256)
    # bf16 matmul operands with f32 accumulation: loosened tolerance vs f32 reference.
    assert jnp.allclose(out, ref, atol=5e-2, rtol=5e-2), "mismatch vs JAX reference (B=8)"

    # Test 2: non-tile-multiple batch exercises the multi-step grid + masked partial block.
    B2 = 200
    features2 = jax.random.normal(jax.random.fold_in(k_feat, 1), (B2, feat_dim), jnp.float32)
    state2 = jax.random.normal(jax.random.fold_in(k_state, 1), (B2, state_dim), jnp.float32)
    out2 = jax.block_until_ready(dense3_forward(features2, state2, prepped, tb=64))
    ref2 = dense3_reference(features2, state2, params)
    assert out2.shape == (B2, 256)
    assert jnp.allclose(out2, ref2, atol=5e-2, rtol=5e-2), "mismatch vs JAX reference (B=200)"

    # Test 3: bf16 output path (halves the dominant HBM output stream; opt-in).
    out3 = jax.block_until_ready(
        dense3_forward(features2, state2, prepped, tb=64, out_dtype=jnp.bfloat16))
    assert out3.dtype == jnp.bfloat16 and out3.shape == (B2, 256)
    assert jnp.allclose(out3.astype(jnp.float32), ref2, atol=7e-2, rtol=7e-2), \
        "mismatch vs JAX reference (bf16 output)"

    print("KERNEL_OK")
</pallas_src>

<mosaic_0001>
module attributes {stable_mosaic.version = 11 : i64} {
  func.func @dense3_kernel(%arg0: i32, %arg1: memref<8x64xbf16, #tpu.memory_space<vmem>>, %arg2: memref<8x64xbf16, #tpu.memory_space<vmem>>, %arg3: memref<64x256xbf16, #tpu.memory_space<vmem>>, %arg4: memref<64x256xbf16, #tpu.memory_space<vmem>>, %arg5: memref<1x256xf32, #tpu.memory_space<vmem>>, %arg6: memref<256x256xbf16, #tpu.memory_space<vmem>>, %arg7: memref<1x256xf32, #tpu.memory_space<vmem>>, %arg8: memref<256x256xbf16, #tpu.memory_space<vmem>>, %arg9: memref<1x256xf32, #tpu.memory_space<vmem>>, %arg10: memref<256x256xbf16, #tpu.memory_space<vmem>>, %arg11: memref<1x256xf32, #tpu.memory_space<vmem>>, %arg12: memref<8x256xf32, #tpu.memory_space<vmem>>) attributes {dimension_semantics = [#tpu.dimension_semantics<parallel>], iteration_bounds = array<i64: 1>, scalar_prefetch = 0 : i64, scratch_operands = 0 : i64, tpu.core_type = #tpu.core_type<tc>, window_params = [{transform_indices = @transform_0, window_bounds = array<i64: 8, 64>}, {transform_indices = @transform_1, window_bounds = array<i64: 8, 64>}, {pipeline_mode = #tpu.pipeline_mode<synchronous>, transform_indices = @transform_2, window_bounds = array<i64: 64, 256>}, {pipeline_mode = #tpu.pipeline_mode<synchronous>, transform_indices = @transform_3, window_bounds = array<i64: 64, 256>}, {pipeline_mode = #tpu.pipeline_mode<synchronous>, transform_indices = @transform_4, window_bounds = array<i64: 1, 256>}, {pipeline_mode = #tpu.pipeline_mode<synchronous>, transform_indices = @transform_5, window_bounds = array<i64: 256, 256>}, {pipeline_mode = #tpu.pipeline_mode<synchronous>, transform_indices = @transform_6, window_bounds = array<i64: 1, 256>}, {pipeline_mode = #tpu.pipeline_mode<synchronous>, transform_indices = @transform_7, window_bounds = array<i64: 256, 256>}, {pipeline_mode = #tpu.pipeline_mode<synchronous>, transform_indices = @transform_8, window_bounds = array<i64: 1, 256>}, {pipeline_mode = #tpu.pipeline_mode<synchronous>, transform_indices = @transform_9, window_bounds = array<i64: 256, 256>}, {pipeline_mode = #tpu.pipeline_mode<synchronous>, transform_indices = @transform_10, window_bounds = array<i64: 1, 256>}, {transform_indices = @transform_11, window_bounds = array<i64: 8, 256>}]} {
    %c0 = arith.constant 0 : index
    %c0_0 = arith.constant 0 : index
    %0 = vector.load %arg1[%c0, %c0_0] : memref<8x64xbf16, #tpu.memory_space<vmem>>, vector<8x64xbf16>
    %c0_1 = arith.constant 0 : index
    %c0_2 = arith.constant 0 : index
    %1 = vector.load %arg3[%c0_1, %c0_2] : memref<64x256xbf16, #tpu.memory_space<vmem>>, vector<64x256xbf16>
    %cst = arith.constant dense<0.000000e+00> : vector<8x256xf32>
    %2 = tpu.matmul %0, %1, %cst {dimension_numbers = #tpu.dot_dimension_numbers<[1], [0], [0], [1], [0, 0, 1, 1], [], []>} : vector<8x64xbf16>, vector<64x256xbf16>, vector<8x256xf32> -> vector<8x256xf32>
    %c0_3 = arith.constant 0 : index
    %c0_4 = arith.constant 0 : index
    %3 = vector.load %arg2[%c0_3, %c0_4] : memref<8x64xbf16, #tpu.memory_space<vmem>>, vector<8x64xbf16>
    %c0_5 = arith.constant 0 : index
    %c0_6 = arith.constant 0 : index
    %4 = vector.load %arg4[%c0_5, %c0_6] : memref<64x256xbf16, #tpu.memory_space<vmem>>, vector<64x256xbf16>
    %cst_7 = arith.constant dense<0.000000e+00> : vector<8x256xf32>
    %5 = tpu.matmul %3, %4, %cst_7 {dimension_numbers = #tpu.dot_dimension_numbers<[1], [0], [0], [1], [0, 0, 1, 1], [], []>} : vector<8x64xbf16>, vector<64x256xbf16>, vector<8x256xf32> -> vector<8x256xf32>
    %6 = arith.addf %2, %5 : vector<8x256xf32>
    %c0_8 = arith.constant 0 : index
    %c0_9 = arith.constant 0 : index
    %7 = vector.load %arg5[%c0_8, %c0_9] : memref<1x256xf32, #tpu.memory_space<vmem>>, vector<1x256xf32>
    %8 = vector.broadcast %7 : vector<1x256xf32> to vector<8x256xf32>
    %9 = arith.addf %6, %8 : vector<8x256xf32>
    %cst_10 = arith.constant 0.000000e+00 : f32
    %10 = vector.broadcast %cst_10 : f32 to vector<8x256xf32>
    %11 = arith.maximumf %9, %10 : vector<8x256xf32>
    %12 = arith.truncf %11 : vector<8x256xf32> to vector<8x256xbf16>
    %c0_11 = arith.constant 0 : index
    %c0_12 = arith.constant 0 : index
    %13 = vector.load %arg6[%c0_11, %c0_12] : memref<256x256xbf16, #tpu.memory_space<vmem>>, vector<256x256xbf16>
    %cst_13 = arith.constant dense<0.000000e+00> : vector<8x256xf32>
    %14 = tpu.matmul %12, %13, %cst_13 {dimension_numbers = #tpu.dot_dimension_numbers<[1], [0], [0], [1], [0, 0, 1, 1], [], []>} : vector<8x256xbf16>, vector<256x256xbf16>, vector<8x256xf32> -> vector<8x256xf32>
    %c0_14 = arith.constant 0 : index
    %c0_15 = arith.constant 0 : index
    %15 = vector.load %arg7[%c0_14, %c0_15] : memref<1x256xf32, #tpu.memory_space<vmem>>, vector<1x256xf32>
    %16 = vector.broadcast %15 : vector<1x256xf32> to vector<8x256xf32>
    %17 = arith.addf %14, %16 : vector<8x256xf32>
    %cst_16 = arith.constant 0.000000e+00 : f32
    %18 = vector.broadcast %cst_16 : f32 to vector<8x256xf32>
    %19 = arith.maximumf %17, %18 : vector<8x256xf32>
    %20 = arith.truncf %19 : vector<8x256xf32> to vector<8x256xbf16>
    %c0_17 = arith.constant 0 : index
    %c0_18 = arith.constant 0 : index
    %21 = vector.load %arg8[%c0_17, %c0_18] : memref<256x256xbf16, #tpu.memory_space<vmem>>, vector<256x256xbf16>
    %cst_19 = arith.constant dense<0.000000e+00> : vector<8x256xf32>
    %22 = tpu.matmul %20, %21, %cst_19 {dimension_numbers = #tpu.dot_dimension_numbers<[1], [0], [0], [1], [0, 0, 1, 1], [], []>} : vector<8x256xbf16>, vector<256x256xbf16>, vector<8x256xf32> -> vector<8x256xf32>
    %c0_20 = arith.constant 0 : index
    %c0_21 = arith.constant 0 : index
    %23 = vector.load %arg9[%c0_20, %c0_21] : memref<1x256xf32, #tpu.memory_space<vmem>>, vector<1x256xf32>
    %24 = vector.broadcast %23 : vector<1x256xf32> to vector<8x256xf32>
    %25 = arith.addf %22, %24 : vector<8x256xf32>
    %cst_22 = arith.constant 0.000000e+00 : f32
    %26 = vector.broadcast %cst_22 : f32 to vector<8x256xf32>
    %27 = arith.maximumf %25, %26 : vector<8x256xf32>
    %28 = arith.truncf %27 : vector<8x256xf32> to vector<8x256xbf16>
    %c0_23 = arith.constant 0 : index
    %c0_24 = arith.constant 0 : index
    %29 = vector.load %arg10[%c0_23, %c0_24] : memref<256x256xbf16, #tpu.memory_space<vmem>>, vector<256x256xbf16>
    %cst_25 = arith.constant dense<0.000000e+00> : vector<8x256xf32>
    %30 = tpu.matmul %28, %29, %cst_25 {dimension_numbers = #tpu.dot_dimension_numbers<[1], [0], [0], [1], [0, 0, 1, 1], [], []>} : vector<8x256xbf16>, vector<256x256xbf16>, vector<8x256xf32> -> vector<8x256xf32>
    %c0_26 = arith.constant 0 : index
    %c0_27 = arith.constant 0 : index
    %31 = vector.load %arg11[%c0_26, %c0_27] : memref<1x256xf32, #tpu.memory_space<vmem>>, vector<1x256xf32>
    %32 = vector.broadcast %31 : vector<1x256xf32> to vector<8x256xf32>
    %33 = arith.addf %30, %32 : vector<8x256xf32>
    %c0_28 = arith.constant 0 : index
    %c0_29 = arith.constant 0 : index
    %34 = vector.load %arg12[%c0_28, %c0_29] : memref<8x256xf32, #tpu.memory_space<vmem>>, vector<8x256xf32>
    tpu.vector_store %arg12[%c0_28, %c0_29], %33 {strides = array<i32>} : memref<8x256xf32, #tpu.memory_space<vmem>>, vector<8x256xf32>,
    return
  }
  func.func @transform_0(%arg0: i32) -> (i32, i32) {
    %c0_i32 = arith.constant 0 : i32
    %c0_i32_0 = arith.constant 0 : i32
    return %arg0, %c0_i32 : i32, i32
  }
  func.func @transform_1(%arg0: i32) -> (i32, i32) {
    %c0_i32 = arith.constant 0 : i32
    %c0_i32_0 = arith.constant 0 : i32
    return %arg0, %c0_i32 : i32, i32
  }
  func.func @transform_2(%arg0: i32) -> (i32, i32) {
    %c0_i32 = arith.constant 0 : i32
    %c0_i32_0 = arith.constant 0 : i32
    %c0_i32_1 = arith.constant 0 : i32
    return %c0_i32, %c0_i32_0 : i32, i32
  }
  func.func @transform_3(%arg0: i32) -> (i32, i32) {
    %c0_i32 = arith.constant 0 : i32
    %c0_i32_0 = arith.constant 0 : i32
    %c0_i32_1 = arith.constant 0 : i32
    return %c0_i32, %c0_i32_0 : i32, i32
  }
  func.func @transform_4(%arg0: i32) -> (i32, i32) {
    %c0_i32 = arith.constant 0 : i32
    %c0_i32_0 = arith.constant 0 : i32
    %c0_i32_1 = arith.constant 0 : i32
    return %c0_i32, %c0_i32_0 : i32, i32
  }
  func.func @transform_5(%arg0: i32) -> (i32, i32) {
    %c0_i32 = arith.constant 0 : i32
    %c0_i32_0 = arith.constant 0 : i32
    %c0_i32_1 = arith.constant 0 : i32
    return %c0_i32, %c0_i32_0 : i32, i32
  }
  func.func @transform_6(%arg0: i32) -> (i32, i32) {
    %c0_i32 = arith.constant 0 : i32
    %c0_i32_0 = arith.constant 0 : i32
    %c0_i32_1 = arith.constant 0 : i32
    return %c0_i32, %c0_i32_0 : i32, i32
  }
  func.func @transform_7(%arg0: i32) -> (i32, i32) {
    %c0_i32 = arith.constant 0 : i32
    %c0_i32_0 = arith.constant 0 : i32
    %c0_i32_1 = arith.constant 0 : i32
    return %c0_i32, %c0_i32_0 : i32, i32
  }
  func.func @transform_8(%arg0: i32) -> (i32, i32) {
    %c0_i32 = arith.constant 0 : i32
    %c0_i32_0 = arith.constant 0 : i32
    %c0_i32_1 = arith.constant 0 : i32
    return %c0_i32, %c0_i32_0 : i32, i32
  }
  func.func @transform_9(%arg0: i32) -> (i32, i32) {
    %c0_i32 = arith.constant 0 : i32
    %c0_i32_0 = arith.constant 0 : i32
    %c0_i32_1 = arith.constant 0 : i32
    return %c0_i32, %c0_i32_0 : i32, i32
  }
  func.func @transform_10(%arg0: i32) -> (i32, i32) {
    %c0_i32 = arith.constant 0 : i32
    %c0_i32_0 = arith.constant 0 : i32
    %c0_i32_1 = arith.constant 0 : i32
    return %c0_i32, %c0_i32_0 : i32, i32
  }
  func.func @transform_11(%arg0: i32) -> (i32, i32) {
    %c0_i32 = arith.constant 0 : i32
    %c0_i32_0 = arith.constant 0 : i32
    return %arg0, %c0_i32 : i32, i32
  }
}

</mosaic_0001>

<bundles_post_ra>
// kernel: dense3_forward.1
= control target key start
LH: loop header
LB: loop body
LE: loop exit
PB: predicated region body
PF: predicated region fallthrough
CT: control target
= control target key end

     0   :  { %16 = vsyncpa [#allocation3], 0  ;;  %s1898_s0 = inlined_call_operand.vmem [shape: bf16[8,64], index: 0, kind: input, shape index: {}]   ;;  %s1899_s1 = inlined_call_operand.vmem [shape: bf16[8,64], index: 1, kind: input, shape index: {}]   ;;  %s1900_s2 = inlined_call_operand.hbm [shape: bf16[64,256], index: 2, kind: input, shape index: {}]   ;;  %s1901_s3 = inlined_call_operand.hbm [shape: bf16[64,256], index: 3, kind: input, shape index: {}]   ;;  %s1902_s4 = inlined_call_operand.vmem [shape: f32[1,256], index: 4, kind: input, shape index: {}]   ;;  %s1903_s5 = inlined_call_operand.hbm [shape: bf16[256,256], index: 5, kind: input, shape index: {}]   ;;  %s1904_s6 = inlined_call_operand.vmem [shape: f32[1,256], index: 6, kind: input, shape index: {}]   ;;  %s1905_s7 = inlined_call_operand.hbm [shape: bf16[256,256], index: 7, kind: input, shape index: {}]   ;;  %s1906_s8 = inlined_call_operand.vmem [shape: f32[1,256], index: 8, kind: input, shape index: {}]   ;;  %s1907_s9 = inlined_call_operand.hbm [shape: bf16[256,256], index: 9, kind: input, shape index: {}]   ;;  %s1908_s10 = inlined_call_operand.vmem [shape: f32[1,256], index: 10, kind: input, shape index: {}]   ;;  %s1909_s11 = inlined_call_operand.hbm [shape: f32[8,256], index: 11, kind: output, shape index: {}]  }
   0x1   :  { %17 = vsyncpa [#allocation6], 0 }
   0x2   :  { %18 = vsyncpa [#allocation9], 0 }
   0x3   :  { %19 = vsyncpa [#allocation4], 0  ;;  %s41_s19 = sshll.u32 %s1901_s3, 4  ;;  %s1790_s20 = smov [#allocation5]   ;;  %s42_s19 = int_to_ptr.hbm [resolvable:$true] %s41_s19 }
   0x4   :  { %s43_s21 = sshll.u32 %s1790_s20, 4  ;;  %s71_s24 = sshll.u32 %s1905_s7, 4  ;;  %s44_s21 = int_to_ptr.vmem [resolvable:$true] %s43_s21  ;;  %s72_s24 = int_to_ptr.hbm [resolvable:$true] %s71_s24 }
   0x5   :  { %s1791_s25 = smov 128   ;;  %s1792_s26 = smov 8  }
   0x6   :  { %49 = dma.hbm_to_vmem [thread:$0]  %s42_s19, 1024, %s44_s21, [#allocation6], %s1791_s25, %s1791_s25, %s1792_s26  }
   0x7   :  { %s1793_s27 = smov [#allocation8]   ;;  %s28_s12 = sshll.u32 %s1900_s2, 4  ;;  %s29_s12 = int_to_ptr.hbm [resolvable:$true] %s28_s12 }
   0x8   :  { %s73_s28 = sshll.u32 %s1793_s27, 4  ;;  %s56_s14 = sshll.u32 %s1903_s5, 4  ;;  %s74_s28 = int_to_ptr.vmem [resolvable:$true] %s73_s28  ;;  %s57_s14 = int_to_ptr.hbm [resolvable:$true] %s56_s14 }
   0x9   :  { %79 = dma.hbm_to_vmem [thread:$0]  %s72_s24, 4096, %s74_s28, [#allocation9], %s1791_s25, %s1791_s25, %s1792_s26  }
   0xa   :  { %s1794_s15 = smov [#allocation2]   ;;  %s1795_s7 = smov [#allocation7]  }
   0xb   :  { %s30_s16 = sshll.u32 %s1794_s15, 4  ;;  %s58_s17 = sshll.u32 %s1795_s7, 4  ;;  %s31_s16 = int_to_ptr.vmem [resolvable:$true] %s30_s16  ;;  %s59_s17 = int_to_ptr.vmem [resolvable:$true] %s58_s17 }
   0xc   :  { %36 = dma.hbm_to_vmem [thread:$0]  %s29_s12, 1024, %s31_s16, [#allocation3], %s1791_s25, %s1791_s25, %s1792_s26  }
   0xd   :  { %s86_s20 = sshll.u32 %s1907_s9, 4  ;;  %s1796_s2 = smov [#allocation10]   ;;  %s87_s20 = int_to_ptr.hbm [resolvable:$true] %s86_s20 }
   0xe   :  { %64 = dma.hbm_to_vmem [thread:$0]  %s57_s14, 4096, %s59_s17, [#allocation6], %s1791_s25, %s1791_s25, %s1792_s26  }
   0xf   :  { %s88_s21 = sshll.u32 %s1796_s2, 4  ;;  %s89_s21 = int_to_ptr.vmem [resolvable:$true] %s88_s21 }
  0x10   :  { %94 = dma.hbm_to_vmem [thread:$0]  %s87_s20, 4096, %s89_s21, [#allocation9], %s1791_s25, %s1791_s25, %s1792_s26  }
  0x11   :  { %1782 = dma.done.wait [#allocation3], 1024  }
  0x12   :  { %1783 = vsyncadd [#allocation3], 4294966272 }
  0x13   :  { %1784 = dma.done.wait [#allocation6], 5120  }
  0x14   :  { %1785 = vsyncadd [#allocation6], 4294962176 }
  0x15   :  { %1786 = dma.done.wait [#allocation9], 8192  }
  0x16   :  { %1787 = vsyncadd [#allocation9], 4294959104  ;;  %v1092_v0 = vld [vmem:[#allocation5 + $0x30] sm:$0xf]  ;;  %v1533_v1 = vld [vmem:[#allocation5 + $0x34] sm:$0xf0] }
  0x17   :  { %v1532_v2 = vld [vmem:[#allocation5 + $0x34] sm:$0xf]  ;;  %v1093_v3 = vor.u32 %v1533_v1, %v1092_v0  ;;  %v1094_v4 = vld [vmem:[#allocation5 + $0x38] sm:$0xf0]  ;;  %v1126_v5 = vld [vmem:[#allocation2 + $0x30] sm:$0xf] }
  0x18   :  { %v1525_v6 = vld [vmem:[#allocation2 + $0x34] sm:$0xf0]  ;;  %v1097_v7 = vor.u32 %v1532_v2, %v1094_v4  ;;  %v1524_v9 = vld [vmem:[#allocation2 + $0x34] sm:$0xf]  ;;  %v1128_v10 = vld [vmem:[#allocation2 + $0x38] sm:$0xf0] }
  0x19   :  { %v1127_v8 = vor.u32 %v1525_v6, %v1126_v5  ;;  %v1084_v11 = vld [vmem:[#allocation5 + $0x20] sm:$0xf]  ;;  %184 = vmatpush.bf16.msra.mxu0 %v1093_v3  ;;  %v1131_v12 = vor.u32 %v1524_v9, %v1128_v10  ;;  %v1531_v13 = vld [vmem:[#allocation5 + $0x24] sm:$0xf0]  ;;  %v1530_v14 = vld [vmem:[#allocation5 + $0x24] sm:$0xf] }
  0x1a   :  { %v1086_v15 = vld [vmem:[#allocation5 + $0x28] sm:$0xf0]  ;;  %197 = vmatpush.bf16.msra.mxu1 %v1097_v7  ;;  %v1085_v16 = vor.u32 %v1531_v13, %v1084_v11  ;;  %v1118_v18 = vld [vmem:[#allocation2 + $0x20] sm:$0xf]  ;;  %v1523_v19 = vld [vmem:[#allocation2 + $0x24] sm:$0xf0] }
  0x1b   :  { %253 = vmatpush.bf16.msra.mxu2 %v1127_v8  ;;  %v1089_v17 = vor.u32 %v1530_v14, %v1086_v15  ;;  %v1522_v20 = vld [vmem:[#allocation2 + $0x24] sm:$0xf]  ;;  %266 = vmatpush.bf16.msra.mxu3 %v1131_v12  ;;  %v1119_v21 = vor.u32 %v1523_v19, %v1118_v18  ;;  %v1120_v22 = vld [vmem:[#allocation2 + $0x28] sm:$0xf0]  ;;  %v1076_v23 = vld [vmem:[#allocation5 + $0x10] sm:$0xf] }
  0x1c   :  { %v1529_v24 = vld [vmem:[#allocation5 + $0x14] sm:$0xf0]  ;;  %v1123_v25 = vor.u32 %v1522_v20, %v1120_v22  ;;  %v1528_v26 = vld [vmem:[#allocation5 + $0x14] sm:$0xf]  ;;  %v1078_v27 = vld [vmem:[#allocation5 + $0x18] sm:$0xf0] }
  0x1d   :  { %v1110_v28 = vld [vmem:[#allocation2 + $0x10] sm:$0xf]  ;;  %185 = vmatpush.bf16.msra.mxu0 %v1085_v16  ;;  %v1077_v29 = vor.u32 %v1529_v24, %v1076_v23  ;;  %v1521_v30 = vld [vmem:[#allocation2 + $0x14] sm:$0xf0]  ;;  %v1520_v31 = vld [vmem:[#allocation2 + $0x14] sm:$0xf]  ;;  %v1081_v33 = vor.u32 %v1528_v26, %v1078_v27 }
  0x1e   :  { %v1112_v32 = vld [vmem:[#allocation2 + $0x18] sm:$0xf0]  ;;  %198 = vmatpush.bf16.msra.mxu1 %v1089_v17  ;;  %v1111_v34 = vor.u32 %v1521_v30, %v1110_v28  ;;  %v1068_v35 = vld [vmem:[#allocation5] sm:$0xf]  ;;  %v1527_v36 = vld [vmem:[#allocation5 + $0x4] sm:$0xf0] }
  0x1f   :  { %254 = vmatpush.bf16.msra.mxu2 %v1119_v21  ;;  %v1526_v37 = vld [vmem:[#allocation5 + $0x4] sm:$0xf]  ;;  %267 = vmatpush.bf16.msra.mxu3 %v1123_v25  ;;  %v1115_v38 = vor.u32 %v1520_v31, %v1112_v32  ;;  %v1070_v39 = vld [vmem:[#allocation5 + $0x8] sm:$0xf0]  ;;  %v1102_v40 = vld [vmem:[#allocation2] sm:$0xf]  ;;  %v1069_v44 = vor.u32 %v1527_v36, %v1068_v35 }
  0x20   :  { %v1519_v41 = vld [vmem:[#allocation2 + $0x4] sm:$0xf0]  ;;  %v1518_v42 = vld [vmem:[#allocation2 + $0x4] sm:$0xf]  ;;  %v1104_v43 = vld [vmem:[#allocation2 + $0x8] sm:$0xf0]  ;;  %v1073_v47 = vor.u32 %v1526_v37, %v1070_v39 }
  0x21   :  { %186 = vmatpush.bf16.msra.mxu0 %v1077_v29  ;;  %v1192_v45 = vld [vmem:[#allocation7 + $0x70] sm:$0xf]  ;;  %v1549_v46 = vld [vmem:[#allocation7 + $0x74] sm:$0xf0]  ;;  %v1103_v48 = vor.u32 %v1519_v41, %v1102_v40  ;;  %vm176_vm0 = vcmask 523264   ;;  %v1107_v51 = vor.u32 %v1518_v42, %v1104_v43  ;;  %s1797_s27 = smov [#allocation11]  }
  0x22   :  { %199 = vmatpush.bf16.msra.mxu1 %v1081_v33  ;;  %v1256_v49 = vld [vmem:[#allocation7 + $0xf0] sm:$0xf]  ;;  %v1565_v50 = vld [vmem:[#allocation7 + $0xf4] sm:$0xf0]  ;;  %v1193_v52 = vor.u32 %v1549_v46, %v1192_v45  ;;  %v1548_v53 = vld [vmem:[#allocation7 + $0x74] sm:$0xf] }
  0x23   :  { %255 = vmatpush.bf16.msra.mxu2 %v1111_v34  ;;  %268 = vmatpush.bf16.msra.mxu3 %v1115_v38  ;;  %v1194_v54 = vld [vmem:[#allocation7 + $0x78] sm:$0xf0]  ;;  %v1564_v55 = vld [vmem:[#allocation7 + $0xf4] sm:$0xf]  ;;  %v1257_v56 = vor.u32 %v1565_v50, %v1256_v49  ;;  %v1184_v58 = vld [vmem:[#allocation7 + $0x60] sm:$0xf] }
  0x24   :  { %v1258_v57 = vld [vmem:[#allocation7 + $0xf8] sm:$0xf0]  ;;  %v1547_v59 = vld [vmem:[#allocation7 + $0x64] sm:$0xf0]  ;;  %v127_v60 = vld [vmem:[%s1899_s1] sm:$0xf]  ;;  %v1197_v0 = vor.u32 %v1548_v53, %v1194_v54 }
  0x25   :  { %187 = vmatpush.bf16.msra.mxu0 %v1069_v44  ;;  %v1248_v61 = vld [vmem:[#allocation7 + $0xe0] sm:$0xf]  ;;  %v1563_v62 = vld [vmem:[#allocation7 + $0xe4] sm:$0xf0]  ;;  %v1261_v1 = vor.u32 %v1564_v55, %v1258_v57  ;;  %v1185_v2 = vor.u32 %v1547_v59, %v1184_v58  ;;  %v1546_v3 = vld [vmem:[#allocation7 + $0x64] sm:$0xf] }
  0x26   :  { %200 = vmatpush.bf16.msra.mxu1 %v1073_v47  ;;  %v118_v63 = vld [vmem:[%s1898_s0] sm:$0xf]  ;;  %v1186_v4 = vld [vmem:[#allocation7 + $0x68] sm:$0xf0]  ;;  %v1562_v5 = vld [vmem:[#allocation7 + $0xe4] sm:$0xf]  ;;  %v1249_v6 = vor.u32 %v1563_v62, %v1248_v61 }
  0x27   :  { %256 = vmatpush.bf16.msra.mxu2 %v1103_v48  ;;  %269 = vmatpush.bf16.msra.mxu3 %v1107_v51  ;;  %v1250_v7 = vld [vmem:[#allocation7 + $0xe8] sm:$0xf0]  ;;  %v1176_v8 = vld [vmem:[#allocation7 + $0x50] sm:$0xf]  ;;  %v1545_v9 = vld [vmem:[#allocation7 + $0x54] sm:$0xf0]  ;;  %v1189_v12 = vor.u32 %v1546_v3, %v1186_v4 }
  0x28   :  { %1098 = vmatmul.msk.bf16.vlgmr.msra.gmra.mxu0 %vm176_vm0, %v127_v60  ;;  %v1240_v10 = vld [vmem:[#allocation7 + $0xd0] sm:$0xf]  ;;  %v1561_v11 = vld [vmem:[#allocation7 + $0xd4] sm:$0xf0]  ;;  %v1253_v13 = vor.u32 %v1562_v5, %v1250_v7  ;;  %v1177_v14 = vor.u32 %v1545_v9, %v1176_v8  ;;  %v1544_v15 = vld [vmem:[#allocation7 + $0x54] sm:$0xf] }
  0x29   :  { %485 = vmatpush.bf16.msrb.mxu0 %v1193_v52  ;;  %1099 = vmatmul.msk.bf16.vlgmr.msra.gmra.mxu1 %vm176_vm0, %v127_v60  ;;  %v1178_v16 = vld [vmem:[#allocation7 + $0x58] sm:$0xf0]  ;;  %v1560_v17 = vld [vmem:[#allocation7 + $0xd4] sm:$0xf]  ;;  %v1241_v18 = vor.u32 %v1561_v11, %v1240_v10  ;;  %v1168_v20 = vld [vmem:[#allocation7 + $0x40] sm:$0xf] }
  0x2a   :  { %498 = vmatpush.bf16.msrb.mxu1 %v1257_v56  ;;  %1132 = vmatmul.msk.bf16.vlgmr.msra.gmra.mxu2 %vm176_vm0, %v118_v63  ;;  %v1242_v19 = vld [vmem:[#allocation7 + $0xd8] sm:$0xf0]  ;;  %v1543_v21 = vld [vmem:[#allocation7 + $0x44] sm:$0xf0]  ;;  %v1232_v22 = vld [vmem:[#allocation7 + $0xc0] sm:$0xf]  ;;  %v1181_v24 = vor.u32 %v1544_v15, %v1178_v16 }
  0x2b   :  { %1133 = vmatmul.msk.bf16.vlgmr.msra.gmra.mxu3 %vm176_vm0, %v118_v63  ;;  %511 = vmatpush.bf16.msrb.mxu2 %v1197_v0  ;;  %v1559_v23 = vld [vmem:[#allocation7 + $0xc4] sm:$0xf0]  ;;  %v1245_v25 = vor.u32 %v1560_v17, %v1242_v19  ;;  %v1169_v26 = vor.u32 %v1543_v21, %v1168_v20  ;;  %v1542_v27 = vld [vmem:[#allocation7 + $0x44] sm:$0xf]  ;;  %v1170_v28 = vld [vmem:[#allocation7 + $0x48] sm:$0xf0] }
  0x2c   :  { %524 = vmatpush.bf16.msrb.mxu3 %v1261_v1  ;;  %v1233_v29 = vor.u32 %v1559_v23, %v1232_v22  ;;  %v1558_v30 = vld [vmem:[#allocation7 + $0xc4] sm:$0xf]  ;;  %v1234_v31 = vld [vmem:[#allocation7 + $0xc8] sm:$0xf0]  ;;  %v1173_v32 = vor.u32 %v1542_v27, %v1170_v28  ;;  %v1160_v34 = vld [vmem:[#allocation7 + $0x30] sm:$0xf] }
  0x2d   :  { %486 = vmatpush.bf16.msrb.mxu0 %v1185_v2  ;;  %v1237_v33 = vor.u32 %v1558_v30, %v1234_v31  ;;  %v1541_v35 = vld [vmem:[#allocation7 + $0x34] sm:$0xf0]  ;;  %v1224_v36 = vld [vmem:[#allocation7 + $0xb0] sm:$0xf]  ;;  %v1540_v39 = vld [vmem:[#allocation7 + $0x34] sm:$0xf] }
  0x2e   :  { %499 = vmatpush.bf16.msrb.mxu1 %v1249_v6  ;;  %v1161_v37 = vor.u32 %v1541_v35, %v1160_v34  ;;  %v1557_v38 = vld [vmem:[#allocation7 + $0xb4] sm:$0xf0]  ;;  %v1162_v40 = vld [vmem:[#allocation7 + $0x38] sm:$0xf0]  ;;  %v1556_v43 = vld [vmem:[#allocation7 + $0xb4] sm:$0xf] }
  0x2f   :  { %512 = vmatpush.bf16.msrb.mxu2 %v1189_v12  ;;  %v1225_v41 = vor.u32 %v1557_v38, %v1224_v36  ;;  %v1165_v42 = vor.u32 %v1540_v39, %v1162_v40  ;;  %v1226_v44 = vld [vmem:[#allocation7 + $0xb8] sm:$0xf0]  ;;  %v1152_v45 = vld [vmem:[#allocation7 + $0x20] sm:$0xf]  ;;  %v1539_v47 = vld [vmem:[#allocation7 + $0x24] sm:$0xf0] }
  0x30   :  { %525 = vmatpush.bf16.msrb.mxu3 %v1253_v13  ;;  %v1229_v46 = vor.u32 %v1556_v43, %v1226_v44  ;;  %v1216_v48 = vld [vmem:[#allocation7 + $0xa0] sm:$0xf]  ;;  %v1555_v49 = vld [vmem:[#allocation7 + $0xa4] sm:$0xf0]  ;;  %v1153_v50 = vor.u32 %v1539_v47, %v1152_v45  ;;  %v1538_v52 = vld [vmem:[#allocation7 + $0x24] sm:$0xf] }
  0x31   :  { %487 = vmatpush.bf16.msrb.mxu0 %v1177_v14  ;;  %v1217_v51 = vor.u32 %v1555_v49, %v1216_v48  ;;  %v1154_v53 = vld [vmem:[#allocation7 + $0x28] sm:$0xf0]  ;;  %v1554_v54 = vld [vmem:[#allocation7 + $0xa4] sm:$0xf]  ;;  %v1144_v58 = vld [vmem:[#allocation7 + $0x10] sm:$0xf] }
  0x32   :  { %500 = vmatpush.bf16.msrb.mxu1 %v1241_v18  ;;  %v1157_v55 = vor.u32 %v1538_v52, %v1154_v53  ;;  %v1218_v56 = vld [vmem:[#allocation7 + $0xa8] sm:$0xf0]  ;;  %v1537_v59 = vld [vmem:[#allocation7 + $0x14] sm:$0xf0]  ;;  %v1208_v60 = vld [vmem:[#allocation7 + $0x90] sm:$0xf] }
  0x33   :  { %513 = vmatpush.bf16.msrb.mxu2 %v1181_v24  ;;  %v1221_v57 = vor.u32 %v1554_v54, %v1218_v56  ;;  %v1145_v61 = vor.u32 %v1537_v59, %v1144_v58  ;;  %v1553_v62 = vld [vmem:[#allocation7 + $0x94] sm:$0xf0]  ;;  %v1536_v63 = vld [vmem:[#allocation7 + $0x14] sm:$0xf]  ;;  %v1146_v1 = vld [vmem:[#allocation7 + $0x18] sm:$0xf0] }
  0x34   :  { %526 = vmatpush.bf16.msrb.mxu3 %v1245_v25  ;;  %v1209_v0 = vor.u32 %v1553_v62, %v1208_v60  ;;  %v1552_v2 = vld [vmem:[#allocation7 + $0x94] sm:$0xf]  ;;  %v1149_v3 = vor.u32 %v1536_v63, %v1146_v1  ;;  %v1210_v4 = vld [vmem:[#allocation7 + $0x98] sm:$0xf0]  ;;  %v1136_v6 = vld [vmem:[#allocation7] sm:$0xf] }
  0x35   :  { %488 = vmatpush.bf16.msrb.mxu0 %v1169_v26  ;;  %v1213_v5 = vor.u32 %v1552_v2, %v1210_v4  ;;  %v1535_v7 = vld [vmem:[#allocation7 + $0x4] sm:$0xf0]  ;;  %v1200_v8 = vld [vmem:[#allocation7 + $0x80] sm:$0xf]  ;;  %v1534_v11 = vld [vmem:[#allocation7 + $0x4] sm:$0xf] }
  0x36   :  { %501 = vmatpush.bf16.msrb.mxu1 %v1233_v29  ;;  %v1137_v9 = vor.u32 %v1535_v7, %v1136_v6  ;;  %v1551_v10 = vld [vmem:[#allocation7 + $0x84] sm:$0xf0]  ;;  %v1138_v12 = vld [vmem:[#allocation7 + $0x8] sm:$0xf0]  ;;  %v1550_v15 = vld [vmem:[#allocation7 + $0x84] sm:$0xf] }
  0x37   :  { %514 = vmatpush.bf16.msrb.mxu2 %v1173_v32  ;;  %v1201_v13 = vor.u32 %v1551_v10, %v1200_v8  ;;  %v1141_v14 = vor.u32 %v1534_v11, %v1138_v12  ;;  %v1202_v16 = vld [vmem:[#allocation7 + $0x88] sm:$0xf0]  ;;  %v1320_v18 = vld [vmem:[#allocation8 + $0x70] sm:$0xf]  ;;  %v1581_v19 = vld [vmem:[#allocation8 + $0x74] sm:$0xf0] }
  0x38   :  { %527 = vmatpush.bf16.msrb.mxu3 %v1237_v33  ;;  %v1205_v17 = vor.u32 %v1550_v15, %v1202_v16  ;;  %v1580_v20 = vld [vmem:[#allocation8 + $0x74] sm:$0xf]  ;;  %v1321_v21 = vor.u32 %v1581_v19, %v1320_v18  ;;  %v1322_v22 = vld [vmem:[#allocation8 + $0x78] sm:$0xf0]  ;;  %v1312_v23 = vld [vmem:[#allocation8 + $0x60] sm:$0xf] }
  0x39   :  { %489 = vmatpush.bf16.msrb.mxu0 %v1161_v37  ;;  %v1579_v24 = vld [vmem:[#allocation8 + $0x64] sm:$0xf0]  ;;  %v1325_v25 = vor.u32 %v1580_v20, %v1322_v22  ;;  %v1578_v26 = vld [vmem:[#allocation8 + $0x64] sm:$0xf]  ;;  %v1314_v27 = vld [vmem:[#allocation8 + $0x68] sm:$0xf0] }
  0x3a   :  { %502 = vmatpush.bf16.msrb.mxu1 %v1225_v41  ;;  %v1384_v28 = vld [vmem:[#allocation8 + $0xf0] sm:$0xf]  ;;  %v1313_v29 = vor.u32 %v1579_v24, %v1312_v23  ;;  %v1597_v30 = vld [vmem:[#allocation8 + $0xf4] sm:$0xf0]  ;;  %v1596_v31 = vld [vmem:[#allocation8 + $0xf4] sm:$0xf]  ;;  %v1317_v33 = vor.u32 %v1578_v26, %v1314_v27 }
  0x3b   :  { %515 = vmatpush.bf16.msrb.mxu2 %v1165_v42  ;;  %v1386_v32 = vld [vmem:[#allocation8 + $0xf8] sm:$0xf0]  ;;  %v1385_v34 = vor.u32 %v1597_v30, %v1384_v28  ;;  %v1304_v36 = vld [vmem:[#allocation8 + $0x50] sm:$0xf]  ;;  %v1577_v37 = vld [vmem:[#allocation8 + $0x54] sm:$0xf0] }
  0x3c   :  { %528 = vmatpush.bf16.msrb.mxu3 %v1229_v46  ;;  %v1389_v35 = vor.u32 %v1596_v31, %v1386_v32  ;;  %v1576_v38 = vld [vmem:[#allocation8 + $0x54] sm:$0xf]  ;;  %v1306_v39 = vld [vmem:[#allocation8 + $0x58] sm:$0xf0]  ;;  %v1376_v40 = vld [vmem:[#allocation8 + $0xe0] sm:$0xf]  ;;  %v1305_v45 = vor.u32 %v1577_v37, %v1304_v36 }
  0x3d   :  { %490 = vmatpush.bf16.msrb.mxu0 %v1153_v50  ;;  %v1595_v41 = vld [vmem:[#allocation8 + $0xe4] sm:$0xf0]  ;;  %v1594_v43 = vld [vmem:[#allocation8 + $0xe4] sm:$0xf]  ;;  %v1378_v44 = vld [vmem:[#allocation8 + $0xe8] sm:$0xf0]  ;;  %v1309_v49 = vor.u32 %v1576_v38, %v1306_v39 }
  0x3e   :  { %503 = vmatpush.bf16.msrb.mxu1 %v1217_v51  ;;  %v1377_v42 = vor.u32 %v1595_v41, %v1376_v40  ;;  %v1381_v46 = vor.u32 %v1594_v43, %v1378_v44  ;;  %v1296_v47 = vld [vmem:[#allocation8 + $0x40] sm:$0xf]  ;;  %v1575_v48 = vld [vmem:[#allocation8 + $0x44] sm:$0xf0]  ;;  %v1368_v50 = vld [vmem:[#allocation8 + $0xd0] sm:$0xf] }
  0x3f   :  { %516 = vmatpush.bf16.msrb.mxu2 %v1157_v55  ;;  %v1593_v51 = vld [vmem:[#allocation8 + $0xd4] sm:$0xf0]  ;;  %v1592_v52 = vld [vmem:[#allocation8 + $0xd4] sm:$0xf]  ;;  %v1574_v53 = vld [vmem:[#allocation8 + $0x44] sm:$0xf]  ;;  %v1297_v59 = vor.u32 %v1575_v48, %v1296_v47 }
  0x40   :  { %529 = vmatpush.bf16.msrb.mxu3 %v1221_v57  ;;  %v1298_v54 = vld [vmem:[#allocation8 + $0x48] sm:$0xf0]  ;;  %v1370_v55 = vld [vmem:[#allocation8 + $0xd8] sm:$0xf0]  ;;  %v1369_v56 = vor.u32 %v1593_v51, %v1368_v50  ;;  %v1360_v58 = vld [vmem:[#allocation8 + $0xc0] sm:$0xf] }
  0x41   :  { %491 = vmatpush.bf16.msrb.mxu0 %v1145_v61  ;;  %v1373_v57 = vor.u32 %v1592_v52, %v1370_v55  ;;  %v1591_v60 = vld [vmem:[#allocation8 + $0xc4] sm:$0xf0]  ;;  %v1590_v61 = vld [vmem:[#allocation8 + $0xc4] sm:$0xf]  ;;  %v1362_v62 = vld [vmem:[#allocation8 + $0xc8] sm:$0xf0]  ;;  %v1301_v63 = vor.u32 %v1574_v53, %v1298_v54 }
  0x42   :  { %504 = vmatpush.bf16.msrb.mxu1 %v1209_v0  ;;  %v1288_v0 = vld [vmem:[#allocation8 + $0x30] sm:$0xf]  ;;  %v1573_v1 = vld [vmem:[#allocation8 + $0x34] sm:$0xf0]  ;;  %v1572_v2 = vld [vmem:[#allocation8 + $0x34] sm:$0xf]  ;;  %v1361_v4 = vor.u32 %v1591_v60, %v1360_v58 }
  0x43   :  { %517 = vmatpush.bf16.msrb.mxu2 %v1149_v3  ;;  %v1290_v3 = vld [vmem:[#allocation8 + $0x38] sm:$0xf0]  ;;  %v1289_v7 = vor.u32 %v1573_v1, %v1288_v0  ;;  %v1280_v10 = vld [vmem:[#allocation8 + $0x20] sm:$0xf]  ;;  %v1571_v11 = vld [vmem:[#allocation8 + $0x24] sm:$0xf0] }
  0x44   :  { %530 = vmatpush.bf16.msrb.mxu3 %v1213_v5  ;;  %v1365_v5 = vor.u32 %v1590_v61, %v1362_v62  ;;  %v1570_v12 = vld [vmem:[#allocation8 + $0x24] sm:$0xf]  ;;  %v1281_v15 = vor.u32 %v1571_v11, %v1280_v10  ;;  %v1354_v37 = vld [vmem:[#allocation8 + $0xb8] sm:$0xf0]  ;;  %v1272_v39 = vld [vmem:[#allocation8 + $0x10] sm:$0xf] }
  0x45   :  { %492 = vmatpush.bf16.msrb.mxu0 %v1137_v9  ;;  %v1293_v9 = vor.u32 %v1572_v2, %v1290_v3  ;;  %v1569_v40 = vld [vmem:[#allocation8 + $0x14] sm:$0xf0]  ;;  %v1568_v41 = vld [vmem:[#allocation8 + $0x14] sm:$0xf]  ;;  %v1274_v43 = vld [vmem:[#allocation8 + $0x18] sm:$0xf0] }
  0x46   :  { %505 = vmatpush.bf16.msrb.mxu1 %v1201_v13  ;;  %v1282_v13 = vld [vmem:[#allocation8 + $0x28] sm:$0xf0]  ;;  %v1277_v44 = vor.u32 %v1568_v41, %v1274_v43  ;;  %v1586_v47 = vld [vmem:[#allocation8 + $0xa4] sm:$0xf]  ;;  %v1264_v51 = vld [vmem:[#allocation8] sm:$0xf] }
  0x47   :  { %518 = vmatpush.bf16.msrb.mxu2 %v1141_v14  ;;  %v275_v14 = vld [vmem:[%s1902_s4] sm:$0x3]  ;;  %v1285_v16 = vor.u32 %v1570_v12, %v1282_v13  ;;  %v1567_v52 = vld [vmem:[#allocation8 + $0x4] sm:$0xf0]  ;;  %v1566_v53 = vld [vmem:[#allocation8 + $0x4] sm:$0xf] }
  0x48   :  { %531 = vmatpush.bf16.msrb.mxu3 %v1205_v17  ;;  %v277_v17 = vperm.slane %v275_v14, 0  ;;  %v278_v19 = vperm.slane %v275_v14, 1  ;;  %v1265_v54 = vor.u32 %v1567_v52, %v1264_v51  ;;  %v1266_v55 = vld [vmem:[#allocation8 + $0x8] sm:$0xf0]  ;;  %v1585_v58 = vld [vmem:[#allocation8 + $0x94] sm:$0xf0] }
  0x49   :  { %739 = vmatpush.bf16.msra.mxu0 %v1321_v21  ;;  %v1584_v60 = vld [vmem:[#allocation8 + $0x94] sm:$0xf]  ;;  %v1338_v61 = vld [vmem:[#allocation8 + $0x98] sm:$0xf0]  ;;  %v1583_v0 = vld [vmem:[#allocation8 + $0x84] sm:$0xf0] }
  0x4a   :  { %752 = vmatpush.bf16.msra.mxu1 %v1385_v34  ;;  %v1589_v34 = vld [vmem:[#allocation8 + $0xb4] sm:$0xf0]  ;;  %v1341_v62 = vor.u32 %v1584_v60, %v1338_v61  ;;  %v1582_v1 = vld [vmem:[#allocation8 + $0x84] sm:$0xf]  ;;  %v1330_v3 = vld [vmem:[#allocation8 + $0x88] sm:$0xf0] }
  0x4b   :  { %765 = vmatpush.bf16.msra.mxu2 %v1325_v25  ;;  %v1440_v10 = vld [vmem:[#allocation10 + $0x60] sm:$0xf]  ;;  %v1611_v11 = vld [vmem:[#allocation10 + $0x64] sm:$0xf0]  ;;  %v1610_v13 = vld [vmem:[#allocation10 + $0x64] sm:$0xf] }
  0x4c   :  { %778 = vmatpush.bf16.msra.mxu3 %v1389_v35  ;;  %v1588_v35 = vld [vmem:[#allocation8 + $0xb4] sm:$0xf]  ;;  %v1442_v14 = vld [vmem:[#allocation10 + $0x68] sm:$0xf0]  ;;  %v1418_v51 = vld [vmem:[#allocation10 + $0x38] sm:$0xf0] }
  0x4d   :  { %740 = vmatpush.bf16.msra.mxu0 %v1313_v29  ;;  %v1357_v38 = vor.u32 %v1588_v35, %v1354_v37  ;;  %v1607_v35 = vld [vmem:[#allocation10 + $0x44] sm:$0xf0]  ;;  %v1496_v37 = vld [vmem:[#allocation10 + $0xd0] sm:$0xf]  ;;  %v1426_v41 = vld [vmem:[#allocation10 + $0x48] sm:$0xf0] }
  0x4e   :  { %753 = vmatpush.bf16.msra.mxu1 %v1377_v42  ;;  %v1273_v42 = vor.u32 %v1569_v40, %v1272_v39  ;;  %v1624_v39 = vld [vmem:[#allocation10 + $0xd4] sm:$0xf]  ;;  %v1606_v40 = vld [vmem:[#allocation10 + $0x44] sm:$0xf]  ;;  %s1052_s28 = sshll.u32 %s1797_s27, 4  ;;  %s1054_s12 = sshll.u32 %s1909_s11, 4  ;;  %s1053_s28 = int_to_ptr.vmem [resolvable:$true] %s1052_s28  ;;  %s1055_s12 = int_to_ptr.hbm [resolvable:$true] %s1054_s12 }
  0x4f   :  { %766 = vmatpush.bf16.msra.mxu2 %v1317_v33  ;;  %v1352_v33 = vld [vmem:[#allocation8 + $0xb0] sm:$0xf] }
  0x50   :  { %779 = vmatpush.bf16.msra.mxu3 %v1381_v46  ;;  %v1353_v36 = vor.u32 %v1589_v34, %v1352_v33  ;;  %v1587_v46 = vld [vmem:[#allocation8 + $0xa4] sm:$0xf0]  ;;  %v1424_v34 = vld [vmem:[#allocation10 + $0x40] sm:$0xf] }
  0x51   :  { %741 = vmatpush.bf16.msra.mxu0 %v1305_v45  ;;  %v1344_v45 = vld [vmem:[#allocation8 + $0xa0] sm:$0xf] }
  0x52   :  { %754 = vmatpush.bf16.msra.mxu1 %v1369_v56  ;;  %v1345_v48 = vor.u32 %v1587_v46, %v1344_v45  ;;  %v1269_v56 = vor.u32 %v1566_v53, %v1266_v55  ;;  %v319_v45 = vld [vmem:[%s1904_s6] sm:$0x3]  ;;  %v1425_v46 = vor.u32 %v1607_v35, %v1424_v34  ;;  %v1618_v35 = vld [vmem:[#allocation10 + $0xa4] sm:$0xf] }
  0x53   :  { %767 = vmatpush.bf16.msra.mxu2 %v1309_v49  ;;  %v1346_v49 = vld [vmem:[#allocation8 + $0xa8] sm:$0xf0]  ;;  %v321_v52 = vperm.slane %v319_v45, 0 }
  0x54   :  { %780 = vmatpush.bf16.msra.mxu3 %v1373_v57  ;;  %v1349_v50 = vor.u32 %v1586_v47, %v1346_v49  ;;  %v1336_v57 = vld [vmem:[#allocation8 + $0x90] sm:$0xf]  ;;  %v1429_v47 = vor.u32 %v1606_v40, %v1426_v41  ;;  %v1605_v49 = vld [vmem:[#allocation10 + $0x34] sm:$0xf0]  ;;  %v1598_v40 = vld [vmem:[#allocation10 + $0x4] sm:$0xf] }
  0x55   :  { %742 = vmatpush.bf16.msra.mxu0 %v1297_v59  ;;  %v1337_v59 = vor.u32 %v1585_v58, %v1336_v57 }
  0x56   :  { %755 = vmatpush.bf16.msra.mxu1 %v1361_v4  ;;  %v1333_v4 = vor.u32 %v1582_v1, %v1330_v3 }
  0x57   :  { %768 = vmatpush.bf16.msra.mxu2 %v1301_v63  ;;  %v1328_v63 = vld [vmem:[#allocation8 + $0x80] sm:$0xf] }
  0x58   :  { %781 = vmatpush.bf16.msra.mxu3 %v1365_v5  ;;  %v1329_v2 = vor.u32 %v1583_v0, %v1328_v63  ;;  %v1448_v5 = vld [vmem:[#allocation10 + $0x70] sm:$0xf] }
  0x59   :  { %743 = vmatpush.bf16.msra.mxu0 %v1289_v7  ;;  %v1612_v7 = vld [vmem:[#allocation10 + $0x74] sm:$0xf] }
  0x5a   :  { %756 = vmatpush.bf16.msra.mxu1 %v1353_v36 }
  0x5b   :  { %769 = vmatpush.bf16.msra.mxu2 %v1293_v9  ;;  %v1450_v9 = vld [vmem:[#allocation10 + $0x78] sm:$0xf0] }
  0x5c   :  { %782 = vmatpush.bf16.msra.mxu3 %v1357_v38  ;;  %v1453_v12 = vor.u32 %v1612_v7, %v1450_v9  ;;  %v1625_v38 = vld [vmem:[#allocation10 + $0xd4] sm:$0xf0]  ;;  %v1623_v9 = vld [vmem:[#allocation10 + $0xc4] sm:$0xf0] }
  0x5d   :  { %744 = vmatpush.bf16.msra.mxu0 %v1281_v15  ;;  %v1512_v15 = vld [vmem:[#allocation10 + $0xf0] sm:$0xf]  ;;  %v1497_v43 = vor.u32 %v1625_v38, %v1496_v37  ;;  %v1392_v38 = vld [vmem:[#allocation10] sm:$0xf] }
  0x5e   :  { %757 = vmatpush.bf16.msra.mxu1 %v1345_v48  ;;  %v1416_v48 = vld [vmem:[#allocation10 + $0x30] sm:$0xf] }
  0x5f   :  { %770 = vmatpush.bf16.msra.mxu2 %v1285_v16  ;;  %v1441_v16 = vor.u32 %v1611_v11, %v1440_v10  ;;  %v1417_v53 = vor.u32 %v1605_v49, %v1416_v48  ;;  %v1622_v10 = vld [vmem:[#allocation10 + $0xc4] sm:$0xf]  ;;  %v1466_v48 = vld [vmem:[#allocation10 + $0x98] sm:$0xf0] }
  0x60   :  { %783 = vmatpush.bf16.msra.mxu3 %v1349_v50  ;;  %v1604_v50 = vld [vmem:[#allocation10 + $0x34] sm:$0xf] }
  0x61   :  { %745 = vmatpush.bf16.msra.mxu0 %v1273_v42  ;;  %v1498_v42 = vld [vmem:[#allocation10 + $0xd8] sm:$0xf0] }
  0x62   :  { %758 = vmatpush.bf16.msra.mxu1 %v1337_v59  ;;  %v322_v59 = vperm.slane %v319_v45, 1  ;;  %v1617_v45 = vld [vmem:[#allocation10 + $0x94] sm:$0xf0] }
  0x63   :  { %771 = vmatpush.bf16.msra.mxu2 %v1277_v44  ;;  %v1501_v44 = vor.u32 %v1624_v39, %v1498_v42  ;;  %v1599_v39 = vld [vmem:[#allocation10 + $0x4] sm:$0xf0]  ;;  %v1394_v42 = vld [vmem:[#allocation10 + $0x8] sm:$0xf0] }
  0x64   :  { %784 = vmatpush.bf16.msra.mxu3 %v1341_v62  ;;  %v1393_v41 = vor.u32 %v1599_v39, %v1392_v38 }
  0x65   :  { %746 = vmatpush.bf16.msra.mxu0 %v1265_v54  ;;  %v1421_v54 = vor.u32 %v1604_v50, %v1418_v51  ;;  %v1456_v50 = vld [vmem:[#allocation10 + $0x80] sm:$0xf]  ;;  %v1615_v51 = vld [vmem:[#allocation10 + $0x84] sm:$0xf0] }
  0x66   :  { %759 = vmatpush.bf16.msra.mxu1 %v1329_v2 }
  0x67   :  { %772 = vmatpush.bf16.msra.mxu2 %v1269_v56 }
  0x68   :  { %785 = vmatpush.bf16.msra.mxu3 %v1333_v4 }
  0xa5   :  { %v189_v6 = vpop.f32.mrf.mxu0 }
  0xa6   :  { %v202_v8 = vpop.f32.mrf.mxu1 }
  0xad   :  { %v258_v18 = vpop.f32.mrf.mxu2  ;;  %v191_v22 = vpop.f32.mrf.mxu0 }
  0xae   :  { %v259_v20 = vadd.f32 %v258_v18, %v189_v6  ;;  %v271_v21 = vpop.f32.mrf.mxu3  ;;  %v204_v24 = vpop.f32.mrf.mxu1  ;;  %v1613_v6 = vld [vmem:[#allocation10 + $0x74] sm:$0xf0]  ;;  %v1628_v18 = vld [vmem:[#allocation10 + $0xf4] sm:$0xf] }
  0xaf   :  { %v272_v23 = vadd.f32 %v271_v21, %v202_v8  ;;  %v1449_v8 = vor.u32 %v1613_v6, %v1448_v5  ;;  %v1609_v24 = vld [vmem:[#allocation10 + $0x54] sm:$0xf0] }
  0xb0   :  { %v281_v25 = vadd.f32 %v277_v17, %v259_v20  ;;  %v1629_v17 = vld [vmem:[#allocation10 + $0xf4] sm:$0xf0]  ;;  %v1445_v20 = vor.u32 %v1610_v13, %v1442_v14  ;;  %v1408_v14 = vld [vmem:[#allocation10 + $0x20] sm:$0xf] }
  0xb1   :  { %v282_v26 = vadd.f32 %v278_v19, %v272_v23  ;;  %v1514_v19 = vld [vmem:[#allocation10 + $0xf8] sm:$0xf0]  ;;  %v1513_v21 = vor.u32 %v1629_v17, %v1512_v15  ;;  %v1432_v23 = vld [vmem:[#allocation10 + $0x50] sm:$0xf]  ;;  %v1603_v15 = vld [vmem:[#allocation10 + $0x24] sm:$0xf0] }
  0xb2   :  { %v283_v27 = vmax.f32 %v281_v25, 0.0  ;;  %v1517_v22 = vor.u32 %v1628_v18, %v1514_v19  ;;  %v1608_v25 = vld [vmem:[#allocation10 + $0x54] sm:$0xf]  ;;  %v1409_v17 = vor.u32 %v1603_v15, %v1408_v14  ;;  %v1410_v18 = vld [vmem:[#allocation10 + $0x28] sm:$0xf0] }
  0xb3   :  { %v284_v28 = vmax.f32 %v282_v26, 0.0  ;;  %v1434_v26 = vld [vmem:[#allocation10 + $0x58] sm:$0xf0]  ;;  %v1480_v19 = vld [vmem:[#allocation10 + $0xb0] sm:$0xf] }
  0xb4   :  { %v285_v29 = vpack.c.bf16 %v283_v27, %v283_v27  ;;  %v1504_v27 = vld [vmem:[#allocation10 + $0xe0] sm:$0xf]  ;;  %v1437_v36 = vor.u32 %v1608_v25, %v1434_v26  ;;  %v1400_v26 = vld [vmem:[#allocation10 + $0x10] sm:$0xf] }
  0xb5   :  { %v286_v30 = vpack.c.bf16 %v284_v28, %v284_v28  ;;  %v260_v31 = vpop.f32.mrf.mxu2  ;;  %v1627_v28 = vld [vmem:[#allocation10 + $0xe4] sm:$0xf0] }
  0xb6   :  { %v273_v32 = vpop.f32.mrf.mxu3  ;;  %493 = vmatmul.bf16.vlgmr.msrb.gmra.mxu0 %v285_v29  ;;  %519 = vmatmul.bf16.vlgmr.msrb.gmra.mxu2 %v285_v29  ;;  %v1505_v29 = vor.u32 %v1627_v28, %v1504_v27  ;;  %v1506_v31 = vld [vmem:[#allocation10 + $0xe8] sm:$0xf0]  ;;  %v1601_v27 = vld [vmem:[#allocation10 + $0x14] sm:$0xf0]  ;;  %v1600_v28 = vld [vmem:[#allocation10 + $0x14] sm:$0xf] }
  0xb7   :  { %506 = vmatmul.bf16.vlgmr.msrb.gmra.mxu1 %v286_v30  ;;  %532 = vmatmul.bf16.vlgmr.msrb.gmra.mxu3 %v286_v30  ;;  %v1626_v30 = vld [vmem:[#allocation10 + $0xe4] sm:$0xf]  ;;  %v1433_v32 = vor.u32 %v1609_v24, %v1432_v23  ;;  %v1620_v23 = vld [vmem:[#allocation10 + $0xb4] sm:$0xf]  ;;  %v1482_v24 = vld [vmem:[#allocation10 + $0xb8] sm:$0xf0] }
  0xb8   :  { %993 = vmatpush.bf16.msrb.mxu0 %v1449_v8  ;;  %1019 = vmatpush.bf16.msrb.mxu2 %v1453_v12  ;;  %v1509_v33 = vor.u32 %v1626_v30, %v1506_v31  ;;  %v1488_v8 = vld [vmem:[#allocation10 + $0xc0] sm:$0xf]  ;;  %v1490_v12 = vld [vmem:[#allocation10 + $0xc8] sm:$0xf0]  ;;  %v1485_v25 = vor.u32 %v1620_v23, %v1482_v24  ;;  %v1402_v30 = vld [vmem:[#allocation10 + $0x18] sm:$0xf0] }
  0xb9   :  { %1006 = vmatpush.bf16.msrb.mxu1 %v1513_v21  ;;  %1032 = vmatpush.bf16.msrb.mxu3 %v1517_v22  ;;  %v1489_v11 = vor.u32 %v1623_v9, %v1488_v8  ;;  %v1493_v13 = vor.u32 %v1622_v10, %v1490_v12  ;;  %v1405_v31 = vor.u32 %v1600_v28, %v1402_v30 }
  0xbc   :  { %994 = vmatpush.bf16.msrb.mxu0 %v1441_v16  ;;  %1020 = vmatpush.bf16.msrb.mxu2 %v1445_v20  ;;  %v1602_v16 = vld [vmem:[#allocation10 + $0x24] sm:$0xf]  ;;  %v1621_v20 = vld [vmem:[#allocation10 + $0xb4] sm:$0xf0] }
  0xbd   :  { %1007 = vmatpush.bf16.msrb.mxu1 %v1505_v29  ;;  %1033 = vmatpush.bf16.msrb.mxu3 %v1509_v33  ;;  %v1413_v21 = vor.u32 %v1602_v16, %v1410_v18  ;;  %v1481_v22 = vor.u32 %v1621_v20, %v1480_v19  ;;  %v1401_v29 = vor.u32 %v1601_v27, %v1400_v26  ;;  %v1619_v33 = vld [vmem:[#allocation10 + $0xa4] sm:$0xf0] }
  0xc0   :  { %995 = vmatpush.bf16.msrb.mxu0 %v1433_v32  ;;  %1021 = vmatpush.bf16.msrb.mxu2 %v1437_v36  ;;  %v1472_v32 = vld [vmem:[#allocation10 + $0xa0] sm:$0xf]  ;;  %v1474_v36 = vld [vmem:[#allocation10 + $0xa8] sm:$0xf0] }
  0xc1   :  { %1008 = vmatpush.bf16.msrb.mxu1 %v1497_v43  ;;  %1034 = vmatpush.bf16.msrb.mxu3 %v1501_v44  ;;  %v1473_v34 = vor.u32 %v1619_v33, %v1472_v32  ;;  %v1477_v37 = vor.u32 %v1618_v35, %v1474_v36  ;;  %v1397_v43 = vor.u32 %v1598_v40, %v1394_v42  ;;  %v1464_v44 = vld [vmem:[#allocation10 + $0x90] sm:$0xf] }
  0xc4   :  { %996 = vmatpush.bf16.msrb.mxu0 %v1425_v46  ;;  %1022 = vmatpush.bf16.msrb.mxu2 %v1429_v47  ;;  %v1616_v46 = vld [vmem:[#allocation10 + $0x94] sm:$0xf]  ;;  %v1465_v47 = vor.u32 %v1617_v45, %v1464_v44 }
  0xc5   :  { %1009 = vmatpush.bf16.msrb.mxu1 %v1489_v11  ;;  %1035 = vmatpush.bf16.msrb.mxu3 %v1493_v13  ;;  %v1469_v49 = vor.u32 %v1616_v46, %v1466_v48  ;;  %v827_v11 = vld [vmem:[%s1908_s10] sm:$0x3] }
  0xc6   :  { %v829_v13 = vperm.slane %v827_v11, 0  ;;  %v830_v18 = vperm.slane %v827_v11, 1 }
  0xc8   :  { %997 = vmatpush.bf16.msrb.mxu0 %v1417_v53  ;;  %1023 = vmatpush.bf16.msrb.mxu2 %v1421_v54  ;;  %v1457_v53 = vor.u32 %v1615_v51, %v1456_v50  ;;  %v1458_v54 = vld [vmem:[#allocation10 + $0x88] sm:$0xf0] }
  0xc9   :  { %1010 = vmatpush.bf16.msrb.mxu1 %v1481_v22  ;;  %1036 = vmatpush.bf16.msrb.mxu3 %v1485_v25 }
  0xcc   :  { %998 = vmatpush.bf16.msrb.mxu0 %v1409_v17  ;;  %1024 = vmatpush.bf16.msrb.mxu2 %v1413_v21 }
  0xcd   :  { %1011 = vmatpush.bf16.msrb.mxu1 %v1473_v34  ;;  %1037 = vmatpush.bf16.msrb.mxu3 %v1477_v37 }
  0xd0   :  { %999 = vmatpush.bf16.msrb.mxu0 %v1401_v29  ;;  %1025 = vmatpush.bf16.msrb.mxu2 %v1405_v31 }
  0xd1   :  { %1012 = vmatpush.bf16.msrb.mxu1 %v1465_v47  ;;  %1038 = vmatpush.bf16.msrb.mxu3 %v1469_v49 }
  0xd4   :  { %1000 = vmatpush.bf16.msrb.mxu0 %v1393_v41  ;;  %1026 = vmatpush.bf16.msrb.mxu2 %v1397_v43 }
  0xd5   :  { %1013 = vmatpush.bf16.msrb.mxu1 %v1457_v53 }
 0x133   :  { %v494_v55 = vpop.f32.mrf.mxu0 }
 0x134   :  { %v495_v56 = vadd.f32 %v494_v55, %v321_v52  ;;  %v507_v57 = vpop.f32.mrf.mxu1  ;;  %v1614_v52 = vld [vmem:[#allocation10 + $0x84] sm:$0xf] }
 0x135   :  { %v1461_v55 = vor.u32 %v1614_v52, %v1458_v54 }
 0x136   :  { %v508_v58 = vadd.f32 %v507_v57, %v495_v56  ;;  %v573_v56 = vld [vmem:[%s1906_s8] sm:$0x3] }
 0x137   :  { %1039 = vmatpush.bf16.msrb.mxu3 %v1461_v55 }
 0x138   :  { %v537_v60 = vmax.f32 %v508_v58, 0.0  ;;  %v575_v58 = vperm.slane %v573_v56, 0 }
 0x139   :  { %v520_v61 = vpop.f32.mrf.mxu2 }
 0x13a   :  { %v539_v62 = vpack.c.bf16 %v537_v60, %v537_v60  ;;  %v521_v63 = vadd.f32 %v520_v61, %v322_v59  ;;  %v533_v0 = vpop.f32.mrf.mxu3 }
 0x13b   :  { %v496_v1 = vpop.f32.mrf.mxu0 }
 0x13c   :  { %v534_v2 = vadd.f32 %v533_v0, %v521_v63  ;;  %v509_v3 = vpop.f32.mrf.mxu1  ;;  %747 = vmatmul.bf16.vlgmr.msra.gmra.mxu0 %v539_v62  ;;  %773 = vmatmul.bf16.vlgmr.msra.gmra.mxu2 %v539_v62  ;;  %v576_v63 = vperm.slane %v573_v56, 1 }
 0x13e   :  { %v538_v4 = vmax.f32 %v534_v2, 0.0 }
 0x140   :  { %v540_v5 = vpack.c.bf16 %v538_v4, %v538_v4 }
 0x141   :  { %v522_v6 = vpop.f32.mrf.mxu2 }
 0x142   :  { %v535_v7 = vpop.f32.mrf.mxu3  ;;  %760 = vmatmul.bf16.vlgmr.msra.gmra.mxu1 %v540_v5  ;;  %786 = vmatmul.bf16.vlgmr.msra.gmra.mxu3 %v540_v5 }
 0x1b9   :  { %v748_v57 = vpop.f32.mrf.mxu0 }
 0x1ba   :  { %v749_v59 = vadd.f32 %v748_v57, %v575_v58 }
 0x1bf   :  { %v761_v60 = vpop.f32.mrf.mxu1  ;;  %v774_v61 = vpop.f32.mrf.mxu2 }
 0x1c0   :  { %v762_v62 = vadd.f32 %v761_v60, %v749_v59  ;;  %v775_v3 = vadd.f32 %v774_v61, %v576_v63 }
 0x1c1   :  { %v750_v0 = vpop.f32.mrf.mxu0 }
 0x1c2   :  { %v791_v1 = vmax.f32 %v762_v62, 0.0 }
 0x1c4   :  { %v793_v2 = vpack.c.bf16 %v791_v1, %v791_v1 }
 0x1c5   :  { %v787_v4 = vpop.f32.mrf.mxu3 }
 0x1c6   :  { %v788_v5 = vadd.f32 %v787_v4, %v775_v3  ;;  %1001 = vmatmul.bf16.vlgmr.msrb.gmra.mxu0 %v793_v2  ;;  %1027 = vmatmul.bf16.vlgmr.msrb.gmra.mxu2 %v793_v2 }
 0x1c7   :  { %v763_v6 = vpop.f32.mrf.mxu1  ;;  %v776_v7 = vpop.f32.mrf.mxu2 }
 0x1c8   :  { %v792_v8 = vmax.f32 %v788_v5, 0.0 }
 0x1ca   :  { %v794_v9 = vpack.c.bf16 %v792_v8, %v792_v8 }
 0x1cc   :  { %1014 = vmatmul.bf16.vlgmr.msrb.gmra.mxu1 %v794_v9  ;;  %1040 = vmatmul.bf16.vlgmr.msrb.gmra.mxu3 %v794_v9 }
 0x1cd   :  { %v789_v10 = vpop.f32.mrf.mxu3 }
 0x243   :  { %v1002_v12 = vpop.f32.mrf.mxu0 }
 0x244   :  { %v1003_v14 = vadd.f32 %v1002_v12, %v829_v13 }
 0x249   :  { %v1015_v15 = vpop.f32.mrf.mxu1  ;;  %v1028_v16 = vpop.f32.mrf.mxu2 }
 0x24a   :  { %v1016_v17 = vadd.f32 %v1015_v15, %v1003_v14  ;;  %v1029_v20 = vadd.f32 %v1028_v16, %v830_v18 }
 0x24b   :  { %v1004_v19 = vpop.f32.mrf.mxu0 }
 0x24c   :  { %1045 = vst [vmem:[#allocation11] sm:$0xff] %v1016_v17 }
 0x24f   :  { %v1041_v21 = vpop.f32.mrf.mxu3 }
 0x250   :  { %v1042_v22 = vadd.f32 %v1041_v21, %v1029_v20 }
 0x251   :  { %v1017_v23 = vpop.f32.mrf.mxu1  ;;  %v1030_v24 = vpop.f32.mrf.mxu2 }
 0x252   :  { %1046 = vst [vmem:[#allocation11 + $0x8] sm:$0xff] %v1042_v22 }
 0x253   :  { %1057 = dma.vmem_to_hbm [thread:$0]  %s1053_s28, 256, %s1055_s12, [#allocation4]  }
 0x257   :  { %v1043_v25 = vpop.f32.mrf.mxu3 }
 0x258   :  { %1788 = dma.done.wait [#allocation4], 256  }
 0x259   :  { %1789 = vsyncadd [#allocation4], 4294967040 }
 0x25a   :  { %1062 = vsyncpa [#allocation3], 1 }
 0x25b   :  { %1063 = vsyncpa [#allocation6], 1 }
 0x25c   :  { %1064 = vsyncpa [#allocation9], 1 }
 0x25d   :  { %1065 = vsyncpa [#allocation4], 1 }

</bundles_post_ra>
